<compile_context>
chip_gen: v6e
topology: v6e:2x2x1
jax: 0.10.0
libtpu: 0.0.40
codegen_flags: <defaults>
</compile_context>

<pallas_src>
import functools

import jax
import jax.numpy as jnp
from jax import lax
from jax.experimental import pallas as pl
from jax.experimental.pallas import tpu as pltpu


# ----------------------------------------------------------------------------
# Kernel bodies
# ----------------------------------------------------------------------------
def _depthwise_taps(src_ref, dw_ref, *, K, dilation, stride, L_out):
    """Per-channel 1D correlation. Taps are ref-level (shifted/strided) loads;
    accumulation happens in f32 on the VPU."""
    C_in = src_ref.shape[0]
    dw = dw_ref[...].astype(jnp.float32)              # (C_in, K), read once
    acc = jnp.zeros((C_in, L_out), jnp.float32)
    for k in range(K):                                 # K is small -> unrolled
        start = k * dilation                           # static offset
        if stride == 1:
            tap = src_ref[:, pl.ds(start, L_out)]
        else:
            tap = src_ref[:, pl.ds(start, L_out, stride)]
        acc = acc + dw[:, k:k + 1] * tap.astype(jnp.float32)
    return acc


def _pointwise(pw_ref, acc, out_dtype):
    """1x1 conv over channels == one MXU matmul: (C_out, C_in) @ (C_in, L)."""
    pw = pw_ref[...]
    if pw.dtype == jnp.bfloat16:
        # bf16 operands -> full-rate MXU on v6e/v7x; accumulate in f32.
        out = jnp.dot(pw, acc.astype(jnp.bfloat16),
                      preferred_element_type=jnp.float32)
    else:
        out = jnp.dot(pw.astype(jnp.float32), acc,
                      preferred_element_type=jnp.float32)
    return out.astype(out_dtype)


def _dsconv1d_single_kernel(x_ref, dw_ref, pw_ref, o_ref, *,
                            K, dilation, stride, L_out):
    # x_ref: (C_in, L_pad) ; dw_ref: (C_in, K) ; pw_ref: (C_out_p, C_in)
    acc = _depthwise_taps(x_ref, dw_ref, K=K, dilation=dilation,
                          stride=stride, L_out=L_out)
    o_ref[...] = _pointwise(pw_ref, acc, o_ref.dtype)


def _dsconv1d_tiled_kernel(x_ref, xh_ref, dw_ref, pw_ref, o_ref, xwin_ref, *,
                           K, dilation, stride, T_out):
    # x_ref: (C_in, T_in) main window ; xh_ref: (C_in, HALO_BLK) halo window.
    T_in = x_ref.shape[1]
    Hb = xh_ref.shape[1]
    # Stitch main + halo into one contiguous VMEM window (both stores are
    # lane-dense, 128-aligned); every tap then reads directly from this ref.
    xwin_ref[:, 0:T_in] = x_ref[...]
    xwin_ref[:, T_in:T_in + Hb] = xh_ref[...]
    acc = _depthwise_taps(xwin_ref, dw_ref, K=K, dilation=dilation,
                          stride=stride, L_out=T_out)
    o_ref[...] = _pointwise(pw_ref, acc, o_ref.dtype)


# ----------------------------------------------------------------------------
# Wrapper
# ----------------------------------------------------------------------------
def _round_up(v, m):
    return -(-v // m) * m


def _pick_l_tile(C_in, stride, itemsize, target):
    # Keep the main x block around <= ~2 MiB so double-buffered inputs +
    # scratch window + f32 accumulator + output block stay comfortably under
    # the default scoped-VMEM limit on all of v5e / v6e / v7x (64 MiB VMEM).
    budget = 2 * 1024 * 1024
    t = budget // max(1, C_in * stride * itemsize)
    t = max(128, (t // 128) * 128)
    return min(t, 2048, _round_up(max(target, 128), 128))


def depthwise_separable_conv1d(x, dw_weight, pw_weight, *, stride=1,
                               padding=0, dilation=1, l_tile_target=512):
    """x: (N, C_in, L). Returns (N, C_out, L_out); matches
    nn.Conv1d(groups=C_in, bias=False) followed by 1x1 nn.Conv1d(bias=False)."""
    N, C_in, L = x.shape
    C_out, C_in_w = pw_weight.shape
    assert C_in_w == C_in
    assert dw_weight.shape[0] == C_in
    K = dw_weight.shape[1]

    L_out = (L + 2 * padding - dilation * (K - 1) - 1) // stride + 1
    assert L_out > 0

    # Pad C_out to a multiple of 8 sublanes (dense store path). Cheap: only
    # touches the tiny pointwise weight; output is sliced back afterwards.
    C_out_p = _round_up(C_out, 8)
    if C_out_p != C_out:
        pw_weight = jnp.pad(pw_weight, ((0, C_out_p - C_out), (0, 0)))

    l_tile = _pick_l_tile(C_in, stride, jnp.dtype(x.dtype).itemsize,
                          l_tile_target)

    if L_out <= l_tile:
        # ------------------ single tile per batch element ------------------
        x_p = jnp.pad(x, ((0, 0), (0, 0), (padding, padding))) if padding > 0 else x
        L_xp = L + 2 * padding
        kernel = functools.partial(_dsconv1d_single_kernel, K=K,
                                   dilation=dilation, stride=stride,
                                   L_out=L_out)
        out = pl.pallas_call(
            kernel,
            out_shape=jax.ShapeDtypeStruct((N, C_out_p, L_out), x.dtype),
            grid_spec=pltpu.PrefetchScalarGridSpec(
                num_scalar_prefetch=0,
                grid=(N,),
                in_specs=[
                    pl.BlockSpec((None, C_in, L_xp), lambda n: (n, 0, 0)),
                    pl.BlockSpec((C_in, K), lambda n: (0, 0)),
                    pl.BlockSpec((C_out_p, C_in), lambda n: (0, 0)),
                ],
                out_specs=pl.BlockSpec((None, C_out_p, L_out),
                                       lambda n: (n, 0, 0)),
            ),
            compiler_params=pltpu.CompilerParams(
                dimension_semantics=("parallel",)),
        )(x_p, dw_weight, pw_weight)
        return out[:, :C_out, :]

    # ------------------------- L-tiled path -------------------------------
    T_out = l_tile                                   # output columns per tile
    halo = dilation * (K - 1) - (stride - 1)         # extra input cols needed
    halo_blk = _round_up(max(halo, 1), 128)          # 128-aligned halo window
    if (T_out * stride) % halo_blk:
        T_out = _round_up(T_out, halo_blk)
    T_in = T_out * stride                            # main input cols per tile
    num_tiles = pl.cdiv(L_out, T_out)
    L_out_p = num_tiles * T_out

    # One combined pad: conv zero-padding + alignment + halo tail, so every
    # input block (main and halo) is read fully in-bounds.
    L_x_needed = num_tiles * T_in + halo_blk
    L_xp = max(L + 2 * padding, L_x_needed)
    x_p = jnp.pad(x, ((0, 0), (0, 0), (padding, L_xp - L - padding)))

    kernel = functools.partial(_dsconv1d_tiled_kernel, K=K, dilation=dilation,
                               stride=stride, T_out=T_out)
    hb = T_in // halo_blk   # halo window start (j+1)*T_in, in halo_blk blocks

    out = pl.pallas_call(
        kernel,
        out_shape=jax.ShapeDtypeStruct((N, C_out_p, L_out_p), x.dtype),
        grid_spec=pltpu.PrefetchScalarGridSpec(
            num_scalar_prefetch=0,
            grid=(N, num_tiles),
            in_specs=[
                # main window: [j*T_in, (j+1)*T_in)
                pl.BlockSpec((None, C_in, T_in), lambda n, j: (n, 0, j)),
                # halo window: [(j+1)*T_in, (j+1)*T_in + halo_blk)
                pl.BlockSpec((None, C_in, halo_blk),
                             lambda n, j: (n, 0, (j + 1) * hb)),
                # weights: constant block index -> DMA'd once, stay resident
                pl.BlockSpec((C_in, K), lambda n, j: (0, 0)),
                pl.BlockSpec((C_out_p, C_in), lambda n, j: (0, 0)),
            ],
            out_specs=pl.BlockSpec((None, C_out_p, T_out),
                                   lambda n, j: (n, 0, j)),
            scratch_shapes=[pltpu.VMEM((C_in, T_in + halo_blk), x.dtype)],
        ),
        compiler_params=pltpu.CompilerParams(
            dimension_semantics=("parallel", "parallel")),
    )(x_p, x_p, dw_weight, pw_weight)
    return out[:, :C_out, :L_out]


# ----------------------------------------------------------------------------
# Pure-JAX reference (matches nn.Conv1d cross-correlation semantics)
# ----------------------------------------------------------------------------
def _reference(x, dw, pw, *, stride, padding, dilation):
    K = dw.shape[1]
    L = x.shape[2]
    L_out = (L + 2 * padding - dilation * (K - 1) - 1) // stride + 1
    xp = jnp.pad(x, ((0, 0), (0, 0), (padding, padding))).astype(jnp.float32)
    y = jnp.zeros((x.shape[0], dw.shape[0], L_out), jnp.float32)
    for k in range(K):
        start = k * dilation
        sl = lax.slice_in_dim(xp, start, start + (L_out - 1) * stride + 1,
                              stride, axis=2)
        y = y + dw[None, :, k:k + 1].astype(jnp.float32) * sl
    out = jnp.einsum("oc,ncl->nol", pw.astype(jnp.float32), y,
                     precision=lax.Precision.HIGHEST)
    return out.astype(x.dtype)


# ----------------------------------------------------------------------------
# Self-test
# ----------------------------------------------------------------------------
if __name__ == "__main__":
    def run_case(name, key, *, N, C_in, C_out, L, K, stride, padding,
                 dilation, l_tile_target):
        kx, kdw, kpw = jax.random.split(key, 3)
        x = jax.random.normal(kx, (N, C_in, L), dtype=jnp.float32)
        dw = jax.random.normal(kdw, (C_in, K), dtype=jnp.float32) * 0.1
        pw = jax.random.normal(kpw, (C_out, C_in), dtype=jnp.float32) * 0.1
        out = depthwise_separable_conv1d(
            x, dw, pw, stride=stride, padding=padding, dilation=dilation,
            l_tile_target=l_tile_target)
        out = jax.block_until_ready(out)
        ref = _reference(x, dw, pw, stride=stride, padding=padding,
                         dilation=dilation)
        assert out.shape == ref.shape, (name, out.shape, ref.shape)
        assert jnp.allclose(out, ref, atol=5e-3, rtol=5e-3), name

    key = jax.random.PRNGKey(0)
    k1, k2, k3 = jax.random.split(key, 3)

    # 1) Small shapes consistent with the module -> single-tile path.
    run_case("small", k1, N=2, C_in=4, C_out=8, L=16, K=3,
             stride=1, padding=1, dilation=1, l_tile_target=512)
    # 2) L-tiled path with halo crossing (two lane-dense 128-wide tiles).
    run_case("tiled", k2, N=2, C_in=8, C_out=16, L=256, K=3,
             stride=1, padding=1, dilation=1, l_tile_target=128)
    # 3) Ragged L_out + dilation + C_out not a multiple of 8 (padded/sliced).
    run_case("ragged", k3, N=1, C_in=6, C_out=12, L=300, K=3,
             stride=1, padding=2, dilation=2, l_tile_target=128)

    print("KERNEL_OK")
</pallas_src>

<mosaic_0001>
module attributes {stable_mosaic.version = 11 : i64} {
  func.func @_dsconv1d_single_kernel(%arg0: i32, %arg1: memref<1x4x18xf32, #tpu.memory_space<vmem>>, %arg2: memref<4x3xf32, #tpu.memory_space<vmem>>, %arg3: memref<8x4xf32, #tpu.memory_space<vmem>>, %arg4: memref<1x8x16xf32, #tpu.memory_space<vmem>>) attributes {dimension_semantics = [#tpu.dimension_semantics<parallel>], iteration_bounds = array<i64: 2>, scalar_prefetch = 0 : i64, scratch_operands = 0 : i64, tpu.core_type = #tpu.core_type<tc>, window_params = [{transform_indices = @transform_0, window_bounds = array<i64: 1, 4, 18>}, {pipeline_mode = #tpu.pipeline_mode<synchronous>, transform_indices = @transform_1, window_bounds = array<i64: 4, 3>}, {pipeline_mode = #tpu.pipeline_mode<synchronous>, transform_indices = @transform_2, window_bounds = array<i64: 8, 4>}, {transform_indices = @transform_3, window_bounds = array<i64: 1, 8, 16>}]} {
    %c0 = arith.constant 0 : index
    %c0_0 = arith.constant 0 : index
    %0 = vector.load %arg2[%c0, %c0_0] : memref<4x3xf32, #tpu.memory_space<vmem>>, vector<4x3xf32>
    %cst = arith.constant 0.000000e+00 : f32
    %1 = vector.broadcast %cst : f32 to vector<4x16xf32>
    %c0_1 = arith.constant 0 : index
    %c0_2 = arith.constant 0 : index
    %c0_3 = arith.constant 0 : index
    %2 = vector.load %arg1[%c0_1, %c0_2, %c0_3] : memref<1x4x18xf32, #tpu.memory_space<vmem>>, vector<1x4x16xf32>
    %3 = vector.shape_cast %2 : vector<1x4x16xf32> to vector<4x16xf32>
    %4 = vector.extract_strided_slice %0 {offsets = [0, 0], sizes = [4, 1], strides = [1, 1]} : vector<4x3xf32> to vector<4x1xf32>
    %5 = vector.broadcast %4 : vector<4x1xf32> to vector<4x16xf32>
    %6 = arith.mulf %5, %3 : vector<4x16xf32>
    %7 = arith.addf %1, %6 : vector<4x16xf32>
    %c0_4 = arith.constant 0 : index
    %c0_5 = arith.constant 0 : index
    %c1 = arith.constant 1 : index
    %8 = vector.load %arg1[%c0_4, %c0_5, %c1] : memref<1x4x18xf32, #tpu.memory_space<vmem>>, vector<1x4x16xf32>
    %9 = vector.shape_cast %8 : vector<1x4x16xf32> to vector<4x16xf32>
    %10 = vector.extract_strided_slice %0 {offsets = [0, 1], sizes = [4, 1], strides = [1, 1]} : vector<4x3xf32> to vector<4x1xf32>
    %11 = vector.broadcast %10 : vector<4x1xf32> to vector<4x16xf32>
    %12 = arith.mulf %11, %9 : vector<4x16xf32>
    %13 = arith.addf %7, %12 : vector<4x16xf32>
    %c0_6 = arith.constant 0 : index
    %c0_7 = arith.constant 0 : index
    %c2 = arith.constant 2 : index
    %14 = vector.load %arg1[%c0_6, %c0_7, %c2] : memref<1x4x18xf32, #tpu.memory_space<vmem>>, vector<1x4x16xf32>
    %15 = vector.shape_cast %14 : vector<1x4x16xf32> to vector<4x16xf32>
    %16 = vector.extract_strided_slice %0 {offsets = [0, 2], sizes = [4, 1], strides = [1, 1]} : vector<4x3xf32> to vector<4x1xf32>
    %17 = vector.broadcast %16 : vector<4x1xf32> to vector<4x16xf32>
    %18 = arith.mulf %17, %15 : vector<4x16xf32>
    %19 = arith.addf %13, %18 : vector<4x16xf32>
    %c0_8 = arith.constant 0 : index
    %c0_9 = arith.constant 0 : index
    %20 = vector.load %arg3[%c0_8, %c0_9] : memref<8x4xf32, #tpu.memory_space<vmem>>, vector<8x4xf32>
    %cst_10 = arith.constant dense<0.000000e+00> : vector<8x16xf32>
    %21 = tpu.matmul %20, %19, %cst_10 {dimension_numbers = #tpu.dot_dimension_numbers<[1], [0], [0], [1], [0, 0, 1, 1], [], []>} : vector<8x4xf32>, vector<4x16xf32>, vector<8x16xf32> -> vector<8x16xf32>
    %c0_11 = arith.constant 0 : index
    %c0_12 = arith.constant 0 : index
    %c0_13 = arith.constant 0 : index
    %22 = vector.load %arg4[%c0_11, %c0_12, %c0_13] : memref<1x8x16xf32, #tpu.memory_space<vmem>>, vector<1x8x16xf32>
    %23 = vector.shape_cast %22 : vector<1x8x16xf32> to vector<8x16xf32>
    %24 = vector.shape_cast %21 : vector<8x16xf32> to vector<1x8x16xf32>
    tpu.vector_store %arg4[%c0_11, %c0_12, %c0_13], %24 {strides = array<i32>} : memref<1x8x16xf32, #tpu.memory_space<vmem>>, vector<1x8x16xf32>,
    return
  }
  func.func @transform_0(%arg0: i32) -> (i32, i32, i32) {
    %c0_i32 = arith.constant 0 : i32
    %c0_i32_0 = arith.constant 0 : i32
    %c0_i32_1 = arith.constant 0 : i32
    return %arg0, %c0_i32, %c0_i32_0 : i32, i32, i32
  }
  func.func @transform_1(%arg0: i32) -> (i32, i32) {
    %c0_i32 = arith.constant 0 : i32
    %c0_i32_0 = arith.constant 0 : i32
    %c0_i32_1 = arith.constant 0 : i32
    return %c0_i32, %c0_i32_0 : i32, i32
  }
  func.func @transform_2(%arg0: i32) -> (i32, i32) {
    %c0_i32 = arith.constant 0 : i32
    %c0_i32_0 = arith.constant 0 : i32
    %c0_i32_1 = arith.constant 0 : i32
    return %c0_i32, %c0_i32_0 : i32, i32
  }
  func.func @transform_3(%arg0: i32) -> (i32, i32, i32) {
    %c0_i32 = arith.constant 0 : i32
    %c0_i32_0 = arith.constant 0 : i32
    %c0_i32_1 = arith.constant 0 : i32
    return %arg0, %c0_i32, %c0_i32_0 : i32, i32, i32
  }
}

</mosaic_0001>

<bundles_post_ra>
// kernel: tpu_custom_call.1
= control target key start
LH: loop header
LB: loop body
LE: loop exit
PB: predicated region body
PF: predicated region fallthrough
CT: control target
= control target key end

     0   :  { %8 = vsyncpa [#allocation3], 0  ;;  %s612_s0 = inlined_call_operand.vmem [shape: f32[2,4,18], index: 0, kind: input, shape index: {}]   ;;  %s613_s1 = inlined_call_operand.vmem [shape: f32[4,3], index: 1, kind: input, shape index: {}]   ;;  %s614_s2 = inlined_call_operand.vmem [shape: f32[8,4], index: 2, kind: input, shape index: {}]   ;;  %s615_s3 = inlined_call_operand.hbm [shape: f32[2,8,16], index: 3, kind: output, shape index: {}]  }
   0x1   :  { %10 = vsyncpa [#allocation3 + $0x1], 0  ;;  %s507_s12 = smov 0   ;;  %s509_s13 = smov 0  }
   0x2   :  { %s511_s14 = smov 0   ;;  %s513_s15 = smov 0  }
   0x3 LB: > { %s528_s16 = sadd.s32 4294967295, %s477_s15   ;;  %s349_s17 = sadd.s32 4294967294, %s477_s15   ;;  %s477_s15 = sphi %s513_s15, %s621_s15   ;;  %s473_s14 = sphi %s511_s14, %s620_s14   ;;  %s469_s13 = sphi %s509_s13, %s619_s13   ;;  %s465_s12 = sphi %s507_s12, %s618_s12  }
   0x4   : > { %s532_s18 = sadd.s32 1, %s477_s15   ;;  %s91_s19 = sadd.s32 1, %s473_s14 }
   0x5   : > { %s88_s20 = ssub.s32 %s477_s15, %s532_s18  ;;  %p101_p0 = scmp.ne.s32.totalorder %s473_s14, %s469_s13 }
   0x6   : > { %p89_p1 = scmp.eq.s32.totalorder %s88_s20, 0  ;;  %p102_p2 = scmp.eq.s32.totalorder %s528_s16, 1 }
   0x7   : > { %p107_p3 = scmp.ne.s32.totalorder %s469_s13, %s465_s12  ;;  %p108_p4 = scmp.eq.s32.totalorder %s349_s17, 1 }
   0x8   : > { %s543_s21 = scalar_select %p89_p1, %s473_s14, %s91_s19  }
   0x9   : > { %p545_p5 = por %p102_p2, %p101_p0  ;;  %p549_p6 = por %p108_p4, %p107_p3 }
   0xa   : > { %p352_p7 = scmp.ge.s32.totalorder %s477_s15, 1  ;;  %p139_p8 = scmp.lt.s32.totalorder %s477_s15, 3 }
   0xc   : > { %p140_p9 = pnand %p352_p7, %p139_p8 }
   0xd   : > { %p162_p10 = scmp.lt.s32.totalorder (!%p140_p9), %s528_s16, 1  ;;  %s484_s4 = smov (!%p140_p9), 127  }
   0xe   : > { %143 = sbr.rel (%p140_p9) target bundleno = 477 (0x1dd), region = 32  ;;  %s485_s5 = smov (!%p140_p9), 126  }
   0xf   : > { %s159_s8 = sand.u32 (!%p140_p9), 1, %s469_s13   ;;  %s358_s10 = sshll.u32 (!%p140_p9), %s528_s16, 7 }
  0x10   : > { %s353_s9 = sshll.u32 (!%p140_p9), %s159_s8, 3  ;;  %s571_s24 = scalar_lea.hbm (!%p140_p9), %s615_s3, %s358_s10 }
  0x11   : > { %s161_s11 = scalar_lea.vmem (!%p140_p9), [#allocation2], %s353_s9  ;;  %s277_s25 = scalar_lea.sflag (!%p140_p9), [#allocation3], %s159_s8 }
  0x12   : > { %s290_s17 = sshll.u32 (!%p140_p9), %s161_s11, 4  ;;  %s573_s17 = int_to_ptr.vmem [resolvable:$true] %s290_s17 }
  0x13   : > { %v166_v0 = vld [vmem:[%s613_s1] sm:$0xf]  ;;  %v479_v1 = vmov 1   ;;  %v480_v2 = vmov 0   ;;  %v481_v3 = vmov 2   ;;  %s163_s26 = scalar_select %p162_p10, %s528_s16, 1 }
  0x14   : > { %414 = vset.pattern.permute.xlu0 %v479_v1  ;;  %416 = vset.pattern.permute.xlu1 %v480_v2  ;;  %v482_v4 = vmov 0.0   ;;  %vm483_vm0 = vmmov 0   ;;  %vm200_vm1 = vcmask 1043456   ;;  %v195_v16 = vld [vmem:[%s614_s2] sm:$0xff]  ;;  %vm196_vm2 = vcmask 31744   ;;  %s486_s16 = smov [#allocation2]  }
  0x15   : > { %176 = vperm.xlu0 %414, %v166_v0   ;;  %170 = vperm.xlu1 %416, %v166_v0   ;;  %s354_s27 = sshll.u32 %s163_s26, 2  ;;  %vm274_vm3 = vcmask 130048   ;;  %s417_s26 = scalar_lea.vmem %s573_s17, 128 }
  0x16   : > { %s165_s30 = scalar_lea.vmem %s612_s0, %s354_s27  ;;  %363 = vmatprep.subr.mxu0 %v482_v4  ;;  %365 = vmatprep.mubr.msk.f32.mxu0 %vm483_vm0, %v482_v4  ;;  %p418_p11 = scmp.ne.s32.totalorder %s573_s17, %s417_s26 }
  0x17   : > { %v167_v5 = vld [vmem:[%s165_s30] sm:$0xf]  ;;  %s421_s27 = sshll.u32 %s486_s16, 4  ;;  %s422_s27 = int_to_ptr.vmem [resolvable:$false] %s421_s27 }
  0x18   : > { %p419_p12 = pnand %p418_p11, %p545_p5  ;;  %s423_s28 = scalar_lea.vmem %s422_s27, 256 }
  0x19   : > { %415 = vset.pattern.permute.xlu0 %v481_v3  ;;  %p424_p0 = scmp.lt.s32.totalorder %s573_s17, %s422_s27  ;;  %p425_p1 = scmp.lt.s32.totalorder %s423_s28, %s417_s26 }
  0x1a   : > { %186 = vperm.xlu0 %415, %v166_v0   ;;  %p420_p13 = pneg %p419_p12 }
  0x1b   : > { %p426_p2 = por %p425_p1, %p424_p0 }
  0x1d   : > { %p427_p3 = pnand %p426_p2, %p420_p13 }
  0x90   : > { %v177_v6 = vpop.permute.xlu0 %176  ;;  %v171_v10 = vpop.permute.xlu1 %170 }
  0x91   : > { %v179_v7 = vmul.f32 %v177_v6, %v167_v5  ;;  %v173_v11 = vmul.f32 %v171_v10, %v167_v5 }
  0x93   : > { %181 = vrot.lane.b32.xlu1 %v179_v7, %s484_s4 }
  0x95   : > { %v187_v8 = vpop.permute.xlu0 %186 }
  0x96   : > { %v189_v9 = vmul.f32 %v187_v8, %v167_v5 }
  0x98   : > { %191 = vrot.lane.b32.xlu1 %v189_v9, %s485_s5 }
 0x105   : > { %v182_v12 = vpop.permute.xlu1 %181 }
 0x106   : > { %v184_v13 = vadd.f32 %v182_v12, %v173_v11 }
 0x10a   : > { %v192_v14 = vpop.permute.xlu1 %191 }
 0x10b   : > { %v194_v15 = vadd.f32 %v192_v14, %v184_v13 }
 0x10d   : > { %364 = vmatpush3.msk.msra.mxu0 %vm200_vm1, %v194_v15 }
 0x10e   : > { %366 = vmatmul.mubr.msk.f32.vlgmr.msra.gmra.mxu0 %vm196_vm2, %v195_v16 }
 0x1ce   : > { %v270_v17 = vpop.f32.mrf.mxu0 }
 0x1cf   : > { %275 = vst.msk [vmem:[%s161_s11] sm:$0xff] %vm274_vm3, %v270_v17 }
 0x1d0   : > { %v367_v18 = vpop.f32.mrf.mxu0 }
 0x1d1   : > { %430 = shalt.err (!%p427_p3)
}
 0x1d2   : > { %s431_s29 = scalar_lea.hbm %s571_s24, 128  ;;  %s435_s5 = scalar_lea.hbm %s615_s3, 256 }
 0x1d3   : > { %p432_p4 = scmp.ne.s32.totalorder %s571_s24, %s431_s29  ;;  %p436_p9 = scmp.lt.s32.totalorder %s571_s24, %s615_s3 }
 0x1d4   : > { %p437_p10 = scmp.lt.s32.totalorder %s435_s5, %s431_s29 }
 0x1d5   : > { %p433_p7 = pnand %p432_p4, %p545_p5 }
 0x1d6   : > { %p438_p11 = por %p437_p10, %p436_p9 }
 0x1d7   : > { %p434_p8 = pneg %p433_p7 }
 0x1d9   : > { %p439_p12 = pnand %p438_p11, %p434_p8 }
 0x1db   : > { %442 = shalt.err (!%p439_p12)
}
 0x1dc   : > { %368 = dma.vmem_to_hbm [thread:$0]  (%p545_p5), %s573_s17, 128, %s571_s24, %s277_s25  }
 0x1dd PF: > { %p374_p13 = scmp.ge.s32.totalorder %s477_s15, 2  ;;  %s302_s8 = sand.u32 1, %s465_s12  }
 0x1de   : > { %s303_s9 = scalar_lea.sflag [#allocation3], %s302_s8 }
 0x1df   : > { %p371_p0 = pnand %p374_p13, %p549_p6 }
 0x1e1   : > { %p372_p1 = pneg %p371_p0 }
 0x1e3   : > { %460 = dma.done.wait (%p372_p1), %s303_s9, 128  }
 0x1e4   : > { %462 = vsyncadd (%p372_p1), %s303_s9, 4294967168  ;;  %p13_p2 = scmp.ge.s32.totalorder %s532_s18, 4   ;;  %s618_s12 = smov %s469_s13 }
 0x1e5   : > { %s619_s13 = smov %s473_s14  ;;  %s620_s14 = smov %s543_s21 }
 0x1e6   : > { %s621_s15 = smov %s532_s18  ;;  %15 = sbr.rel (!%p13_p2) target bundleno = 3 (0x3), region = 67 }
 0x1eb   :  { %308 = vsyncpa [#allocation3], 1 }
 0x1ec   :  { %310 = vsyncpa [#allocation3 + $0x1], 1 }

</bundles_post_ra>
